<compile_context>
chip_gen: v7x
topology: tpu7x:2x2x1
jax: 0.10.0
libtpu: 0.0.40
codegen_flags: <defaults>
</compile_context>

<pallas_src>
from functools import partial

import jax
import jax.numpy as jnp
import numpy as np
from jax.experimental import pallas as pl
from jax.experimental.pallas import tpu as pltpu

LANE = 128


def _round_up(x, m):
    return ((x + m - 1) // m) * m


# ---------------------------------------------------------------------------
# Kernel: fused multi-layer perceptron on one row tile.
#   refs = (x_ref, w0, b0, w1, b1, ..., w_{L-1}, b_{L-1}, o_ref)
# Weights arrive as bf16 (resident in VMEM); biases as f32.
# ---------------------------------------------------------------------------
def _mlp_kernel(*refs, num_layers, sigmoid_output):
    x_ref = refs[0]
    o_ref = refs[-1]
    wb_refs = refs[1:-1]

    h = x_ref[...].astype(jnp.float32)               # (tm, in_dim) f32
    for i in range(num_layers):                      # static, unrolled layer loop
        w = wb_refs[2 * i][...]                      # (d_in_p, d_out_p) bf16, resident
        b = wb_refs[2 * i + 1][...]                  # (1, d_out_p) f32
        # bf16 operands on the MXU, f32 accumulation; bias add stays f32.
        h = jnp.dot(h.astype(w.dtype), w,
                    preferred_element_type=jnp.float32) + b
        if i < num_layers - 1:
            h = jnp.maximum(h, 0.0)                  # ReLU between hidden layers (f32)
    if sigmoid_output:
        h = jax.nn.sigmoid(h)                        # f32 EUP path
    o_ref[...] = h.astype(o_ref.dtype)


# ---------------------------------------------------------------------------
# Parameter padding: make every layer's output (and the next layer's input)
# dim a multiple of 128 lanes. The first layer's input dim is left as-is so x
# never needs an extra HBM padding pass. Zero padding is exact: padded hidden
# units are 0 (zero W cols + zero bias), survive ReLU as 0, and the next
# layer's padded input rows are zero, so they contribute nothing.
# ---------------------------------------------------------------------------
def _pad_params_lane_dense(params, lane=LANE):
    padded = []
    prev_pad = params[0][0].shape[0]                 # keep input dim unpadded
    for (w, b) in params:
        d_in, d_out = w.shape
        d_in_p = prev_pad
        d_out_p = _round_up(d_out, lane)
        w_p = jnp.zeros((d_in_p, d_out_p), w.dtype).at[:d_in, :d_out].set(w)
        b_p = jnp.zeros((1, d_out_p), b.dtype).at[:, :d_out].set(b)
        padded.append((w_p, b_p))
        prev_pad = d_out_p
    return padded


def _row_axis_semantics(num_row_tiles):
    """CORE_PARALLEL on v7x (2 TCs) when there is work to split; else 'parallel'."""
    try:
        kind = jax.devices()[0].device_kind.lower()
    except Exception:
        kind = ""
    if ("v7" in kind or "7x" in kind) and num_row_tiles >= 2:
        return (pltpu.CORE_PARALLEL,)
    return ("parallel",)


# ---------------------------------------------------------------------------
# Wrapper
# ---------------------------------------------------------------------------
def mlp_forward(x, params, *, sigmoid_output=False, block_rows=512,
                vmem_budget_bytes=40 << 20):
    """params = [(w0, b0), ...]; w_i stored as (in, out), b_i as (1, out)."""
    num_layers = len(params)
    in_dim = x.shape[-1]
    out_dim = params[-1][0].shape[1]
    lead_shape = x.shape[:-1]

    # Flatten leading dims into one row axis -> fewer, fatter grid steps.
    x2 = x.reshape(-1, in_dim)
    M = x2.shape[0]

    # Lane-dense (128-multiple) hidden/output dims; weights cast to bf16 once.
    pparams = _pad_params_lane_dense(params)
    pparams = [(w.astype(jnp.bfloat16), b.astype(jnp.float32)) for w, b in pparams]
    out_pad = pparams[-1][0].shape[1]
    max_dim = max([in_dim] + [w.shape[1] for w, _ in pparams])

    # Resident weight/bias bytes (single-buffered via pl.Buffered(1)).
    w_bytes = sum(int(np.prod(w.shape)) * w.dtype.itemsize +
                  int(np.prod(b.shape)) * b.dtype.itemsize for w, b in pparams)

    x_item = jnp.dtype(x.dtype).itemsize

    def footprint(tm):
        io = 2 * tm * in_dim * x_item + 2 * tm * out_pad * x_item   # double-buffered x / out tiles
        live = 2 * tm * max_dim * 4                                  # f32 intermediates live across a matmul
        return w_bytes + io + live

    # Row tile: multiple of 8 sublanes, sized to the VMEM budget.
    tm = max(8, min(_round_up(block_rows, 8), _round_up(M, 8)))
    while tm > 8 and footprint(tm) > vmem_budget_bytes:
        tm = max(8, _round_up(tm // 2, 8))

    grid = (pl.cdiv(M, tm),)       # ragged last block: Pallas masks output writes
    vmem_limit = int(min(footprint(tm) + (8 << 20), 64 << 20))

    resident = pl.Buffered(1)      # constant index_map -> fetched once, no double buffer
    in_specs = [pl.BlockSpec((tm, in_dim), lambda i: (i, 0))]
    flat_params = []
    for w, b in pparams:
        flat_params.append(w)
        flat_params.append(b)
        in_specs.append(pl.BlockSpec(w.shape, lambda i: (0, 0), pipeline_mode=resident))
        in_specs.append(pl.BlockSpec(b.shape, lambda i: (0, 0), pipeline_mode=resident))

    kernel = partial(_mlp_kernel, num_layers=num_layers,
                     sigmoid_output=sigmoid_output)

    out = pl.pallas_call(
        kernel,
        out_shape=jax.ShapeDtypeStruct((M, out_pad), x.dtype),
        grid=grid,
        in_specs=in_specs,
        out_specs=pl.BlockSpec((tm, out_pad), lambda i: (i, 0)),
        compiler_params=pltpu.CompilerParams(
            dimension_semantics=_row_axis_semantics(grid[0]),
            vmem_limit_bytes=vmem_limit),
    )(x2, *flat_params)

    if out_pad != out_dim:
        out = out[:, :out_dim]
    return out.reshape(lead_shape + (out_dim,))


# ---------------------------------------------------------------------------
# Parameter construction (deterministic, synthetic) — mirrors the nn.Linear stack
# ---------------------------------------------------------------------------
def init_mlp_params(key, input_dim, hidden_dim, output_dim, num_layers):
    dims = [input_dim] + [hidden_dim] * (num_layers - 1) + [output_dim]
    keys = jax.random.split(key, num_layers)
    params = []
    for i in range(num_layers):
        kw, kb = jax.random.split(keys[i])
        w = 0.05 * jax.random.normal(kw, (dims[i], dims[i + 1]), jnp.float32)
        b = 0.05 * jax.random.normal(kb, (1, dims[i + 1]), jnp.float32)
        params.append((w, b))
    return params


# ---------------------------------------------------------------------------
# Pure-JAX reference (same bf16-matmul / f32-accumulate numerics as the kernel)
# ---------------------------------------------------------------------------
def _ref_mlp(x, params, sigmoid_output=False):
    h = x.astype(jnp.float32)
    n = len(params)
    for i, (w, b) in enumerate(params):
        h = jnp.dot(h.astype(jnp.bfloat16), w.astype(jnp.bfloat16),
                    preferred_element_type=jnp.float32) + b[0]
        if i < n - 1:
            h = jnp.maximum(h, 0.0)
    if sigmoid_output:
        h = jax.nn.sigmoid(h)
    return h.astype(x.dtype)


# ---------------------------------------------------------------------------
if __name__ == "__main__":
    B, N = 2, 8                                  # 16 flattened rows
    INPUT_DIM, HIDDEN_DIM, OUTPUT_DIM = 32, 64, 32
    NUM_LAYERS = 3

    root = jax.random.PRNGKey(0)
    kx, kp = jax.random.split(root)

    params = init_mlp_params(kp, INPUT_DIM, HIDDEN_DIM, OUTPUT_DIM, NUM_LAYERS)
    x = jax.random.normal(kx, (B, N, INPUT_DIM), jnp.float32)

    # Plain MLP head.
    y = mlp_forward(x, params, sigmoid_output=False)
    y = jax.block_until_ready(y)
    y_ref = _ref_mlp(x, params, sigmoid_output=False)
    assert y.shape == (B, N, OUTPUT_DIM)
    assert np.allclose(np.asarray(y), np.asarray(y_ref), atol=2e-2, rtol=2e-2)

    # Sigmoid-output variant (exercises the other code path).
    ys = mlp_forward(x, params, sigmoid_output=True)
    ys = jax.block_until_ready(ys)
    ys_ref = _ref_mlp(x, params, sigmoid_output=True)
    assert np.allclose(np.asarray(ys), np.asarray(ys_ref), atol=2e-2, rtol=2e-2)

    print("KERNEL_OK")
</pallas_src>

<mosaic_0001>
module attributes {stable_mosaic.version = 11 : i64} {
  func.func @_mlp_kernel(%arg0: i32, %arg1: memref<16x32xf32, #tpu.memory_space<vmem>>, %arg2: memref<32x128xbf16, #tpu.memory_space<vmem>>, %arg3: memref<1x128xf32, #tpu.memory_space<vmem>>, %arg4: memref<128x128xbf16, #tpu.memory_space<vmem>>, %arg5: memref<1x128xf32, #tpu.memory_space<vmem>>, %arg6: memref<128x128xbf16, #tpu.memory_space<vmem>>, %arg7: memref<1x128xf32, #tpu.memory_space<vmem>>, %arg8: memref<16x128xf32, #tpu.memory_space<vmem>>) attributes {dimension_semantics = [#tpu.dimension_semantics<parallel>], iteration_bounds = array<i64: 1>, scalar_prefetch = 0 : i64, scratch_operands = 0 : i64, tpu.core_type = #tpu.core_type<tc>, window_params = [{transform_indices = @transform_0, window_bounds = array<i64: 16, 32>}, {pipeline_mode = #tpu.pipeline_mode<synchronous>, transform_indices = @transform_1, window_bounds = array<i64: 32, 128>}, {pipeline_mode = #tpu.pipeline_mode<synchronous>, transform_indices = @transform_2, window_bounds = array<i64: 1, 128>}, {pipeline_mode = #tpu.pipeline_mode<synchronous>, transform_indices = @transform_3, window_bounds = array<i64: 128, 128>}, {pipeline_mode = #tpu.pipeline_mode<synchronous>, transform_indices = @transform_4, window_bounds = array<i64: 1, 128>}, {pipeline_mode = #tpu.pipeline_mode<synchronous>, transform_indices = @transform_5, window_bounds = array<i64: 128, 128>}, {pipeline_mode = #tpu.pipeline_mode<synchronous>, transform_indices = @transform_6, window_bounds = array<i64: 1, 128>}, {transform_indices = @transform_7, window_bounds = array<i64: 16, 128>}]} {
    %c0 = arith.constant 0 : index
    %c0_0 = arith.constant 0 : index
    %0 = vector.load %arg1[%c0, %c0_0] : memref<16x32xf32, #tpu.memory_space<vmem>>, vector<16x32xf32>
    %c0_1 = arith.constant 0 : index
    %c0_2 = arith.constant 0 : index
    %1 = vector.load %arg2[%c0_1, %c0_2] : memref<32x128xbf16, #tpu.memory_space<vmem>>, vector<32x128xbf16>
    %c0_3 = arith.constant 0 : index
    %c0_4 = arith.constant 0 : index
    %2 = vector.load %arg3[%c0_3, %c0_4] : memref<1x128xf32, #tpu.memory_space<vmem>>, vector<1x128xf32>
    %3 = arith.truncf %0 : vector<16x32xf32> to vector<16x32xbf16>
    %cst = arith.constant dense<0.000000e+00> : vector<16x128xf32>
    %4 = tpu.matmul %3, %1, %cst {dimension_numbers = #tpu.dot_dimension_numbers<[1], [0], [0], [1], [0, 0, 1, 1], [], []>} : vector<16x32xbf16>, vector<32x128xbf16>, vector<16x128xf32> -> vector<16x128xf32>
    %5 = vector.broadcast %2 : vector<1x128xf32> to vector<16x128xf32>
    %6 = arith.addf %4, %5 : vector<16x128xf32>
    %cst_5 = arith.constant 0.000000e+00 : f32
    %7 = vector.broadcast %cst_5 : f32 to vector<16x128xf32>
    %8 = arith.maximumf %6, %7 : vector<16x128xf32>
    %c0_6 = arith.constant 0 : index
    %c0_7 = arith.constant 0 : index
    %9 = vector.load %arg4[%c0_6, %c0_7] : memref<128x128xbf16, #tpu.memory_space<vmem>>, vector<128x128xbf16>
    %c0_8 = arith.constant 0 : index
    %c0_9 = arith.constant 0 : index
    %10 = vector.load %arg5[%c0_8, %c0_9] : memref<1x128xf32, #tpu.memory_space<vmem>>, vector<1x128xf32>
    %11 = arith.truncf %8 : vector<16x128xf32> to vector<16x128xbf16>
    %cst_10 = arith.constant dense<0.000000e+00> : vector<16x128xf32>
    %12 = tpu.matmul %11, %9, %cst_10 {dimension_numbers = #tpu.dot_dimension_numbers<[1], [0], [0], [1], [0, 0, 1, 1], [], []>} : vector<16x128xbf16>, vector<128x128xbf16>, vector<16x128xf32> -> vector<16x128xf32>
    %13 = vector.broadcast %10 : vector<1x128xf32> to vector<16x128xf32>
    %14 = arith.addf %12, %13 : vector<16x128xf32>
    %cst_11 = arith.constant 0.000000e+00 : f32
    %15 = vector.broadcast %cst_11 : f32 to vector<16x128xf32>
    %16 = arith.maximumf %14, %15 : vector<16x128xf32>
    %c0_12 = arith.constant 0 : index
    %c0_13 = arith.constant 0 : index
    %17 = vector.load %arg6[%c0_12, %c0_13] : memref<128x128xbf16, #tpu.memory_space<vmem>>, vector<128x128xbf16>
    %c0_14 = arith.constant 0 : index
    %c0_15 = arith.constant 0 : index
    %18 = vector.load %arg7[%c0_14, %c0_15] : memref<1x128xf32, #tpu.memory_space<vmem>>, vector<1x128xf32>
    %19 = arith.truncf %16 : vector<16x128xf32> to vector<16x128xbf16>
    %cst_16 = arith.constant dense<0.000000e+00> : vector<16x128xf32>
    %20 = tpu.matmul %19, %17, %cst_16 {dimension_numbers = #tpu.dot_dimension_numbers<[1], [0], [0], [1], [0, 0, 1, 1], [], []>} : vector<16x128xbf16>, vector<128x128xbf16>, vector<16x128xf32> -> vector<16x128xf32>
    %21 = vector.broadcast %18 : vector<1x128xf32> to vector<16x128xf32>
    %22 = arith.addf %20, %21 : vector<16x128xf32>
    %c0_17 = arith.constant 0 : index
    %c0_18 = arith.constant 0 : index
    %23 = vector.load %arg8[%c0_17, %c0_18] : memref<16x128xf32, #tpu.memory_space<vmem>>, vector<16x128xf32>
    tpu.vector_store %arg8[%c0_17, %c0_18], %22 {strides = array<i32>} : memref<16x128xf32, #tpu.memory_space<vmem>>, vector<16x128xf32>,
    return
  }
  func.func @transform_0(%arg0: i32) -> (i32, i32) {
    %c0_i32 = arith.constant 0 : i32
    %c0_i32_0 = arith.constant 0 : i32
    return %arg0, %c0_i32 : i32, i32
  }
  func.func @transform_1(%arg0: i32) -> (i32, i32) {
    %c0_i32 = arith.constant 0 : i32
    %c0_i32_0 = arith.constant 0 : i32
    %c0_i32_1 = arith.constant 0 : i32
    return %c0_i32, %c0_i32_0 : i32, i32
  }
  func.func @transform_2(%arg0: i32) -> (i32, i32) {
    %c0_i32 = arith.constant 0 : i32
    %c0_i32_0 = arith.constant 0 : i32
    %c0_i32_1 = arith.constant 0 : i32
    return %c0_i32, %c0_i32_0 : i32, i32
  }
  func.func @transform_3(%arg0: i32) -> (i32, i32) {
    %c0_i32 = arith.constant 0 : i32
    %c0_i32_0 = arith.constant 0 : i32
    %c0_i32_1 = arith.constant 0 : i32
    return %c0_i32, %c0_i32_0 : i32, i32
  }
  func.func @transform_4(%arg0: i32) -> (i32, i32) {
    %c0_i32 = arith.constant 0 : i32
    %c0_i32_0 = arith.constant 0 : i32
    %c0_i32_1 = arith.constant 0 : i32
    return %c0_i32, %c0_i32_0 : i32, i32
  }
  func.func @transform_5(%arg0: i32) -> (i32, i32) {
    %c0_i32 = arith.constant 0 : i32
    %c0_i32_0 = arith.constant 0 : i32
    %c0_i32_1 = arith.constant 0 : i32
    return %c0_i32, %c0_i32_0 : i32, i32
  }
  func.func @transform_6(%arg0: i32) -> (i32, i32) {
    %c0_i32 = arith.constant 0 : i32
    %c0_i32_0 = arith.constant 0 : i32
    %c0_i32_1 = arith.constant 0 : i32
    return %c0_i32, %c0_i32_0 : i32, i32
  }
  func.func @transform_7(%arg0: i32) -> (i32, i32) {
    %c0_i32 = arith.constant 0 : i32
    %c0_i32_0 = arith.constant 0 : i32
    return %arg0, %c0_i32 : i32, i32
  }
}

</mosaic_0001>

<bundles_post_ra>
// kernel: tpu_custom_call.1
= control target key start
LH: loop header
LB: loop body
LE: loop exit
PB: predicated region body
PF: predicated region fallthrough
CT: control target
= control target key end

     0   :  { %12 = vsyncpa [#allocation3], 0  ;;  %s809_s0 = inlined_call_operand.hbm [shape: f32[16,32], index: 0, kind: input, shape index: {}]   ;;  %s810_s1 = inlined_call_operand.hbm [shape: bf16[32,128], index: 1, kind: input, shape index: {}]   ;;  %s811_s2 = inlined_call_operand.vmem [shape: f32[1,128], index: 2, kind: input, shape index: {}]   ;;  %s812_s3 = inlined_call_operand.hbm [shape: bf16[128,128], index: 3, kind: input, shape index: {}]   ;;  %s813_s4 = inlined_call_operand.vmem [shape: f32[1,128], index: 4, kind: input, shape index: {}]   ;;  %s814_s5 = inlined_call_operand.hbm [shape: bf16[128,128], index: 5, kind: input, shape index: {}]   ;;  %s815_s6 = inlined_call_operand.vmem [shape: f32[1,128], index: 6, kind: input, shape index: {}]   ;;  %s816_s7 = inlined_call_operand.hbm [shape: f32[16,128], index: 7, kind: output, shape index: {}]  }
   0x1   :  { %13 = vsyncpa [#allocation6], 0 }
   0x2   :  { %14 = vsyncpa [#allocation9], 0 }
   0x3   :  { %15 = vsyncpa [#allocation4], 0  ;;  %s643_s24 = smov [#allocation5]   ;;  %s525_s28 = scalar_lea.hbm %s810_s1, 256 }
   0x4   :  { %s33_s25 = sshll.u32 %s643_s24, 4  ;;  %p526_p0 = scmp.ne.s32.totalorder %s810_s1, %s525_s28  ;;  %s34_s25 = int_to_ptr.vmem [resolvable:$true] %s33_s25 }
   0x5   :  { %p529_p1 = scmp.lt.u32.totalorder %s525_s28, %s810_s1 }
   0x7   :  { %p531_p2 = pnand %p529_p1, %p526_p0 }
   0x9   :  { %534 = shalt.err (!%p531_p2)
}
   0xa   :  { %s535_s10 = scalar_lea.vmem %s34_s25, 256  ;;  %p540_p4 = scmp.lt.s32.totalorder %s34_s25, %s34_s25 }
   0xb   :  { %p536_p3 = scmp.ne.s32.totalorder %s34_s25, %s535_s10  ;;  %p541_p5 = scmp.lt.s32.totalorder %s535_s10, %s535_s10 }
   0xd   :  { %p542_p6 = por %p541_p5, %p540_p4 }
   0xf   :  { %p543_p7 = pnand %p542_p6, %p536_p3 }
  0x11   :  { %546 = shalt.err (!%p543_p7)
}
  0x12   :  { %s644_s11 = smov 64   ;;  %s645_s12 = smov 4  }
  0x13   :  { %39 = dma.hbm_to_vmem [thread:$0]  %s810_s1, 256, %s34_s25, [#allocation6], %s644_s11, %s644_s11, %s645_s12  }
  0x14   :  { %s646_s15 = smov [#allocation2]   ;;  %s547_s19 = scalar_lea.hbm %s809_s0, 256 }
  0x15   :  { %s21_s16 = sshll.u32 %s646_s15, 4  ;;  %p548_p8 = scmp.ne.s32.totalorder %s809_s0, %s547_s19  ;;  %s22_s16 = int_to_ptr.vmem [resolvable:$true] %s21_s16 }
  0x16   :  { %p551_p9 = scmp.lt.u32.totalorder %s547_s19, %s809_s0 }
  0x18   :  { %p553_p10 = pnand %p551_p9, %p548_p8 }
  0x1a   :  { %556 = shalt.err (!%p553_p10)
}
  0x1b   :  { %s557_s24 = scalar_lea.vmem %s22_s16, 256  ;;  %p562_p12 = scmp.lt.s32.totalorder %s22_s16, %s22_s16 }
  0x1c   :  { %p558_p11 = scmp.ne.s32.totalorder %s22_s16, %s557_s24  ;;  %p563_p13 = scmp.lt.s32.totalorder %s557_s24, %s557_s24 }
  0x1e   :  { %p564_p0 = por %p563_p13, %p562_p12 }
  0x20   :  { %p565_p1 = pnand %p564_p0, %p558_p11 }
  0x22   :  { %568 = shalt.err (!%p565_p1)
}
  0x23   :  { %s647_s1 = smov 128   ;;  %s648_s25 = smov 8  }
  0x24   :  { %27 = dma.hbm_to_vmem [thread:$0]  %s809_s0, 256, %s22_s16, [#allocation3], %s647_s1, %s647_s1, %s648_s25  }
  0x25   :  { %s649_s28 = smov [#allocation7]   ;;  %s650_s30 = smov [#allocation8]  }
  0x26   :  { %s47_s29 = sshll.u32 %s649_s28, 4  ;;  %s61_s8 = sshll.u32 %s650_s30, 4  ;;  %s48_s29 = int_to_ptr.vmem [resolvable:$true] %s47_s29  ;;  %s724_s8 = int_to_ptr.vmem [resolvable:$true] %s61_s8 }
  0x27   :  { %s569_s13 = scalar_lea.hbm %s812_s3, 1024 }
  0x28   :  { %p570_p2 = scmp.ne.s32.totalorder %s812_s3, %s569_s13  ;;  %p573_p3 = scmp.lt.u32.totalorder %s569_s13, %s812_s3 }
  0x2a   :  { %p575_p4 = pnand %p573_p3, %p570_p2 }
  0x2c   :  { %578 = shalt.err (!%p575_p4)
}
  0x2d   :  { %s579_s0 = scalar_lea.vmem %s48_s29, 1024  ;;  %p584_p6 = scmp.lt.s32.totalorder %s48_s29, %s48_s29 }
  0x2e   :  { %p580_p5 = scmp.ne.s32.totalorder %s48_s29, %s579_s0  ;;  %p585_p7 = scmp.lt.s32.totalorder %s579_s0, %s579_s0 }
  0x30   :  { %p586_p8 = por %p585_p7, %p584_p6 }
  0x32   :  { %p587_p9 = pnand %p586_p8, %p580_p5 }
  0x34   :  { %590 = shalt.err (!%p587_p9)
}
  0x35   :  { %53 = dma.hbm_to_vmem [thread:$0]  %s812_s3, 1024, %s48_s29, [#allocation6], %s644_s11, %s644_s11, %s645_s12  }
  0x36   :  { %s591_s22 = scalar_lea.hbm %s814_s5, 1024 }
  0x37   :  { %p592_p10 = scmp.ne.s32.totalorder %s814_s5, %s591_s22  ;;  %p595_p11 = scmp.lt.u32.totalorder %s591_s22, %s814_s5 }
  0x39   :  { %p597_p12 = pnand %p595_p11, %p592_p10 }
  0x3b   :  { %600 = shalt.err (!%p597_p12)
}
  0x3c   :  { %s601_s28 = scalar_lea.vmem %s724_s8, 1024  ;;  %p606_p0 = scmp.lt.s32.totalorder %s724_s8, %s724_s8 }
  0x3d   :  { %p602_p13 = scmp.ne.s32.totalorder %s724_s8, %s601_s28  ;;  %p607_p1 = scmp.lt.s32.totalorder %s601_s28, %s601_s28 }
  0x3f   :  { %p608_p2 = por %p607_p1, %p606_p0 }
  0x41   :  { %p609_p3 = pnand %p608_p2, %p602_p13 }
  0x43   :  { %612 = shalt.err (!%p609_p3)
}
  0x44   :  { %67 = dma.hbm_to_vmem [thread:$0]  %s814_s5, 1024, %s724_s8, [#allocation9], %s644_s11, %s644_s11, %s645_s12  }
  0x45   :  { %635 = dma.done.wait [#allocation3], 256  }
  0x46   :  { %636 = vsyncadd [#allocation3], 4294967040 }
  0x47   :  { %637 = dma.done.wait [#allocation6], 1280  }
  0x48   :  { %638 = vsyncadd [#allocation6], 4294966016 }
  0x49   :  { %639 = dma.done.wait [#allocation9], 1024  }
  0x4a   :  { %640 = vsyncadd [#allocation9], 4294966272  ;;  %v651_v0 = vmov 0.0   ;;  %vm652_vm0 = vmmov 0   ;;  %v507_v1 = vld [vmem:[#allocation5] sm:$0xff]   ;;  %v508_v2 = vld [vmem:[#allocation5 + $0x8] sm:$0xff]  }
  0x4b   :  { %448 = vmatprep.subr.bf16.mxu0 %v651_v0  ;;  %452 = vmatprep.mubr.msk.bf16.mxu0 %vm652_vm0, %v651_v0  ;;  %v83_v3 = vld [vmem:[#allocation2] sm:$0xff]  ;;  %v84_v4 = vld [vmem:[#allocation2 + $0x8] sm:$0xff]  ;;  %vm109_vm1 = vcmask 261120   ;;  %v511_v8 = vld [vmem:[#allocation7 + $0x10] sm:$0xff]   ;;  %s653_s9 = smov [#allocation10]  }
  0x4c   :  { %456 = vmatprep.subr.bf16.mxu1 %v651_v0  ;;  %472 = vmatprep.mubr.msk.bf16.mxu1 %vm652_vm0, %v651_v0  ;;  %v509_v5 = vld [vmem:[#allocation7] sm:$0xff]   ;;  %v90_v6 = vpack.c.bf16 %v84_v4, %v83_v3  ;;  %v510_v7 = vld [vmem:[#allocation7 + $0x8] sm:$0xff]   ;;  %v512_v9 = vld [vmem:[#allocation7 + $0x18] sm:$0xff]   ;;  %s391_s10 = sshll.u32 %s653_s9, 4  ;;  %s392_s10 = int_to_ptr.vmem [resolvable:$true] %s391_s10 }
  0x4d   :  { %449 = vmatpush3.bf16.msra.mxu0 %v507_v1  ;;  %457 = vmatpush3.bf16.msra.mxu1 %v509_v5  ;;  %v513_v10 = vld [vmem:[#allocation7 + $0x20] sm:$0xff]   ;;  %v514_v11 = vld [vmem:[#allocation7 + $0x28] sm:$0xff]   ;;  %v515_v12 = vld [vmem:[#allocation7 + $0x30] sm:$0xff]   ;;  %p618_p5 = scmp.lt.s32.totalorder %s392_s10, %s392_s10 }
  0x4e   :  { %450 = vmatprep.subr.bf16.mxu0 %v651_v0  ;;  %458 = vmatprep.subr.bf16.mxu1 %v651_v0  ;;  %v516_v13 = vld [vmem:[#allocation7 + $0x38] sm:$0xff]   ;;  %v517_v14 = vld [vmem:[#allocation8] sm:$0xff]   ;;  %v518_v15 = vld [vmem:[#allocation8 + $0x8] sm:$0xff]  }
  0x4f   :  { %v519_v16 = vld [vmem:[#allocation8 + $0x10] sm:$0xff]   ;;  %v520_v17 = vld [vmem:[#allocation8 + $0x18] sm:$0xff]   ;;  %v521_v18 = vld [vmem:[#allocation8 + $0x20] sm:$0xff]  }
  0x50   :  { %v522_v19 = vld [vmem:[#allocation8 + $0x28] sm:$0xff]   ;;  %v405_v20 = vld [vmem:[%s811_s2] ss:$0 sm:$0xff]  ;;  %v523_v30 = vld [vmem:[#allocation8 + $0x30] sm:$0xff]  }
  0x51   :  { %451 = vmatpush3.bf16.msra.mxu0 %v508_v2  ;;  %459 = vmatpush3.bf16.msra.mxu1 %v510_v7  ;;  %v524_v31 = vld [vmem:[#allocation8 + $0x38] sm:$0xff]   ;;  %v409_v32 = vld [vmem:[%s813_s4] ss:$0 sm:$0xff]  ;;  %s613_s4 = scalar_lea.vmem %s392_s10, 256 }
  0x52   :  { %476 = vmatprep.subr.bf16.mxu0 %v651_v0  ;;  %460 = vmatprep.subr.bf16.mxu1 %v651_v0  ;;  %v418_v42 = vld [vmem:[%s815_s6] ss:$0 sm:$0xff]  ;;  %p614_p4 = scmp.ne.s32.totalorder %s392_s10, %s613_s4  ;;  %p619_p6 = scmp.lt.s32.totalorder %s613_s4, %s613_s4 }
  0x54   :  { %453 = vmatmul.mubr.msk.bf16.vlgmr.msra.gmra.mrb[0].mxu0 %vm109_vm1, %v90_v6  ;;  %p620_p7 = por %p619_p6, %p618_p5 }
  0x55   :  { %492 = vmatprep.mubr.msk.bf16.mxu0 %vm652_vm0, %v651_v0  ;;  %461 = vmatpush3.bf16.msra.mxu1 %v511_v8 }
  0x56   :  { %462 = vmatprep.subr.bf16.mxu1 %v651_v0  ;;  %477 = vmatpush3.bf16.msra.mxu0 %v517_v14  ;;  %p621_p8 = pnand %p620_p7, %p614_p4 }
  0x57   :  { %478 = vmatprep.subr.bf16.mxu0 %v651_v0 }
  0x59   :  { %463 = vmatpush3.bf16.msra.mxu1 %v512_v9 }
  0x5a   :  { %464 = vmatprep.subr.bf16.mxu1 %v651_v0  ;;  %479 = vmatpush3.bf16.msra.mxu0 %v518_v15 }
  0x5b   :  { %480 = vmatprep.subr.bf16.mxu0 %v651_v0 }
  0x5d   :  { %465 = vmatpush3.bf16.msra.mxu1 %v513_v10 }
  0x5e   :  { %466 = vmatprep.subr.bf16.mxu1 %v651_v0  ;;  %481 = vmatpush3.bf16.msra.mxu0 %v519_v16 }
  0x5f   :  { %482 = vmatprep.subr.bf16.mxu0 %v651_v0 }
  0x61   :  { %467 = vmatpush3.bf16.msra.mxu1 %v514_v11 }
  0x62   :  { %468 = vmatprep.subr.bf16.mxu1 %v651_v0  ;;  %483 = vmatpush3.bf16.msra.mxu0 %v520_v17 }
  0x63   :  { %484 = vmatprep.subr.bf16.mxu0 %v651_v0 }
  0x65   :  { %469 = vmatpush3.bf16.msra.mxu1 %v515_v12 }
  0x66   :  { %470 = vmatprep.subr.bf16.mxu1 %v651_v0  ;;  %485 = vmatpush3.bf16.msra.mxu0 %v521_v18 }
  0x67   :  { %486 = vmatprep.subr.bf16.mxu0 %v651_v0 }
  0x69   :  { %471 = vmatpush3.bf16.msra.mxu1 %v516_v13 }
  0x6a   :  { %487 = vmatpush3.bf16.msra.mxu0 %v522_v19 }
  0x6b   :  { %488 = vmatprep.subr.bf16.mxu0 %v651_v0 }
  0x6e   :  { %489 = vmatpush3.bf16.msra.mxu0 %v523_v30 }
  0x6f   :  { %490 = vmatprep.subr.bf16.mxu0 %v651_v0 }
  0x72   :  { %491 = vmatpush3.bf16.msra.mxu0 %v524_v31 }
 0x127   :  { %v147_v21 = vpop.f32.mrb[0].mxu0 }
 0x128   :  { %v148_v22 = vadd.f32 %v405_v20, %v147_v21  ;;  %v454_v23 = vpop.f32.mrb[1].mxu0 }
 0x129   :  { %v150_v24 = vpop.f32.mrb[2].mxu0 }
 0x12a   :  { %v151_v25 = vadd.f32 %v405_v20, %v150_v24  ;;  %v455_v26 = vpop.f32.mrb[3].mxu0  ;;  %v154_v27 = vmax.f32 %v148_v22, 0.0 }
 0x12c   :  { %v155_v28 = vmax.f32 %v151_v25, 0.0 }
 0x12e   :  { %v173_v29 = vpack.c.bf16 %v155_v28, %v154_v27 }
 0x130   :  { %473 = vmatmul.mubr.bf16.vlgmr.msra.gmra.mrb[0].mxu1 %v173_v29 }
 0x203   :  { %v262_v33 = vpop.f32.mrb[0].mxu1 }
 0x204   :  { %v263_v34 = vadd.f32 %v409_v32, %v262_v33  ;;  %v474_v35 = vpop.f32.mrb[1].mxu1 }
 0x205   :  { %v265_v36 = vpop.f32.mrb[2].mxu1 }
 0x206   :  { %v266_v37 = vadd.f32 %v409_v32, %v265_v36  ;;  %v475_v38 = vpop.f32.mrb[3].mxu1  ;;  %v269_v39 = vmax.f32 %v263_v34, 0.0 }
 0x208   :  { %v270_v40 = vmax.f32 %v266_v37, 0.0 }
 0x20a   :  { %v288_v41 = vpack.c.bf16 %v270_v40, %v269_v39 }
 0x20c   :  { %493 = vmatmul.mubr.bf16.vlgmr.msra.gmra.mrb[4].mxu0 %v288_v41 }
 0x2df   :  { %v377_v43 = vpop.f32.mrb[4].mxu0 }
 0x2e0   :  { %v378_v44 = vadd.f32 %v418_v42, %v377_v43  ;;  %v494_v45 = vpop.f32.mrb[5].mxu0 }
 0x2e1   :  { %v380_v46 = vpop.f32.mrb[6].mxu0 }
 0x2e2   :  { %384 = vst [vmem:[#allocation10] sm:$0xff] %v378_v44  ;;  %v381_v47 = vadd.f32 %v418_v42, %v380_v46  ;;  %v495_v48 = vpop.f32.mrb[7].mxu0 }
 0x2e4   :  { %385 = vst [vmem:[#allocation10 + $0x8] sm:$0xff] %v381_v47 }
 0x2e5   :  { %624 = shalt.err (!%p621_p8)
}
 0x2e6   :  { %s625_s14 = scalar_lea.hbm %s816_s7, 256 }
 0x2e7   :  { %p626_p9 = scmp.ne.s32.totalorder %s816_s7, %s625_s14  ;;  %p629_p10 = scmp.lt.u32.totalorder %s625_s14, %s816_s7 }
 0x2e9   :  { %p631_p11 = pnand %p629_p10, %p626_p9 }
 0x2eb   :  { %634 = shalt.err (!%p631_p11)
}
 0x2ec   :  { %397 = dma.vmem_to_hbm [thread:$0]  %s392_s10, 256, %s816_s7, [#allocation4], %s647_s1, %s647_s1, %s648_s25  }
 0x2ed   :  { %641 = dma.done.wait [#allocation4], 256  }
 0x2ee   :  { %642 = vsyncadd [#allocation4], 4294967040 }
 0x2ef   :  { %401 = vsyncpa [#allocation3], 1 }
 0x2f0   :  { %402 = vsyncpa [#allocation6], 1 }
 0x2f1   :  { %403 = vsyncpa [#allocation9], 1 }
 0x2f2   :  { %404 = vsyncpa [#allocation4], 1 }

</bundles_post_ra>
